<compile_context>
chip_gen: v7x
topology: tpu7x:2x2x1
jax: 0.10.0
libtpu: 0.0.40
codegen_flags: <defaults>
</compile_context>

<pallas_src>
import functools

import jax
import jax.numpy as jnp
from jax.experimental import pallas as pl
from jax.experimental.pallas import tpu as pltpu


def _round_up(x, m):
    return ((x + m - 1) // m) * m


def _simam_kernel(x_ref, o_ref, *, inv_hw, inv_n, e_lambda):
    # x_ref: (tile_rows, HW) block in VMEM; each row is one (b, c) channel.
    x = x_ref[...].astype(jnp.float32)

    # Per-row spatial mean (sum * 1/HW keeps the divide off the per-element path).
    mean = jnp.sum(x, axis=1, keepdims=True) * inv_hw
    xm = x - mean

    # Two-pass row sum of squared deviations. The square is recomputed below
    # instead of keeping `d` live across the reduction (VALU has ~2x slack,
    # so the recompute is free and it shrinks peak VMEM temporaries).
    s = jnp.sum(xm * xm, axis=1, keepdims=True)

    # Per-row reciprocal of the denominator: the hw-wide work is multiplies
    # only. Exact reciprocal on a (tile_rows, 1) column is essentially free.
    inv_denom = pl.reciprocal(4.0 * (s * inv_n + e_lambda), approx=False)

    y = (xm * xm) * inv_denom + 0.5
    o_ref[...] = (x * jax.nn.sigmoid(y)).astype(o_ref.dtype)


def _tpu_vmem_and_cores():
    """Best-effort (VMEM bytes per TensorCore, TensorCores per chip)."""
    kind = ""
    try:
        kind = jax.devices()[0].device_kind.lower()
    except Exception:  # pragma: no cover - defensive
        pass
    vmem = None
    try:
        vmem = int(pltpu.get_tpu_info().vmem_capacity_bytes)
    except Exception:  # pragma: no cover - defensive
        vmem = None
    if vmem is None:
        # v7x has 64 MiB per TC; v5e/v6e have 128 MiB.
        vmem = (64 << 20) if "v7" in kind else (128 << 20)
    num_tc = 2 if ("v7" in kind or vmem <= (64 << 20)) else 1
    return vmem, num_tc


def _choose_tiling(bc, hw, dtype):
    """Pick (tile_rows, vmem_limit_bytes) for the (bc, hw) slab."""
    itemsize = jnp.dtype(dtype).itemsize
    # Sublane quantum per dtype width: f32 -> 8, bf16 -> 16, int8/fp8 -> 32.
    sub_q = {4: 8, 2: 16, 1: 32}.get(itemsize, 8)
    # Lane-padded row width actually resident in VMEM/vregs (masked lanes when
    # hw is not a multiple of 128 still occupy space; HBM traffic stays dense).
    hw_pad = _round_up(hw, 128)

    vmem_phys, num_tc = _tpu_vmem_and_cores()
    if vmem_phys <= (64 << 20):
        # v7x-class: only 64 MiB VMEM per TensorCore -> smaller blocks/limit.
        target_block_bytes = 4 << 20
        vmem_limit = 48 << 20
    else:
        # v5e/v6e-class: 128 MiB physical VMEM.
        target_block_bytes = 8 << 20
        vmem_limit = 64 << 20

    # Per-row VMEM footprint:
    #   * in + out pipeline tiles, each double-buffered: 4 * itemsize bytes
    #   * in-kernel f32 temporaries (x upcast, xm, result), lane-padded;
    #     one extra full tile when the input is narrower than f32.
    n_f32_temps = 3 if itemsize == 4 else 4
    row_bytes = 4 * hw_pad * itemsize + n_f32_temps * hw_pad * 4

    headroom = 8 << 20  # compiler temps / internal scratch
    usable = max(vmem_limit - headroom, row_bytes * sub_q)
    rows_vmem = max(sub_q, (usable // row_bytes) // sub_q * sub_q)

    # HBM-side per-step block-size target (keeps the ~0.35 us/step overhead
    # under ~10% of step time on all generations).
    rows_blk = max(sub_q, (target_block_bytes // max(hw_pad * itemsize, 1)) // sub_q * sub_q)

    rows = min(rows_vmem, rows_blk, _round_up(bc, sub_q))

    # Megacore: on 2-TC chips aim for >= 4 balanced "parallel" steps so both
    # TensorCores stay fed; single-TC chips keep the biggest block that fits
    # (the grid is a serial loop there, so extra splits are pure overhead).
    if num_tc >= 2 and bc >= 4 * sub_q:
        rows_4 = max(sub_q, (bc // 4) // sub_q * sub_q)
        rows = min(rows, rows_4)

    # Large-hw guard: even one sublane-quantum row block (double-buffered, with
    # temps) must fit; raise the scoped limit for that shape rather than fail.
    min_footprint = sub_q * row_bytes + headroom
    if min_footprint > vmem_limit:
        cap = max(vmem_limit, vmem_phys - (8 << 20))
        vmem_limit = min(min_footprint, cap)
        # TODO(synk): for shapes where even one sublane-quantum row block
        # exceeds physical VMEM, split the h*w (lane) axis with an 'arbitrary'
        # grid dimension + running-sum scratch instead of raising the limit.

    return rows, vmem_limit


def simam(x, e_lambda=1e-4):
    """SimAM forward. x: (b, c, h, w) array."""
    b, c, h, w = x.shape
    hw = h * w
    bc = b * c

    n = hw - 1
    # Matches PyTorch's behavior for the degenerate h*w == 1 case (NaN) without
    # tripping a Python ZeroDivisionError at trace time.
    inv_n = (1.0 / n) if n > 0 else float("inf")
    inv_hw = 1.0 / hw

    x2d = x.reshape(bc, hw)

    tile_rows, vmem_limit = _choose_tiling(bc, hw, x.dtype)
    grid = pl.cdiv(bc, tile_rows)  # ragged last block is padded/masked by Pallas

    kernel = functools.partial(
        _simam_kernel,
        inv_hw=float(inv_hw),
        inv_n=float(inv_n),
        e_lambda=float(e_lambda),
    )

    out2d = pl.pallas_call(
        kernel,
        out_shape=jax.ShapeDtypeStruct((bc, hw), x.dtype),
        grid_spec=pltpu.PrefetchScalarGridSpec(
            num_scalar_prefetch=0,
            grid=(grid,),
            in_specs=[pl.BlockSpec((tile_rows, hw), lambda i: (i, 0))],
            out_specs=pl.BlockSpec((tile_rows, hw), lambda i: (i, 0)),
        ),
        compiler_params=pltpu.CompilerParams(
            dimension_semantics=("parallel",),
            vmem_limit_bytes=int(vmem_limit),
        ),
    )(x2d)

    return out2d.reshape(b, c, h, w)


def _simam_ref(x, e_lambda=1e-4):
    # Pure-JAX reference matching the PyTorch module.
    n = x.shape[2] * x.shape[3] - 1
    mu = jnp.mean(x, axis=(2, 3), keepdims=True)
    d = (x - mu) ** 2
    y = d / (4.0 * (jnp.sum(d, axis=(2, 3), keepdims=True) / n + e_lambda)) + 0.5
    return x * jax.nn.sigmoid(y)


if __name__ == "__main__":
    key = jax.random.PRNGKey(0)
    b, c, h, w = 2, 4, 16, 16
    x = jax.random.normal(key, (b, c, h, w), dtype=jnp.float32)

    out = jax.block_until_ready(simam(x))
    ref = _simam_ref(x)
    assert out.shape == (b, c, h, w)
    assert jnp.allclose(out, ref, atol=1e-5, rtol=1e-5), "mismatch vs reference"

    # Non-divisible b*c and h*w not a multiple of 128 (masked-lane path).
    x2 = jax.random.normal(jax.random.PRNGKey(1), (3, 3, 14, 14), dtype=jnp.float32)
    out2 = jax.block_until_ready(simam(x2))
    assert jnp.allclose(out2, _simam_ref(x2), atol=1e-5, rtol=1e-5), "ragged mismatch"

    # bfloat16 input exercises the 16-row sublane-quantum tiling path.
    x3 = jax.random.normal(jax.random.PRNGKey(2), (2, 4, 16, 16), dtype=jnp.bfloat16)
    out3 = jax.block_until_ready(simam(x3))
    ref3 = _simam_ref(x3.astype(jnp.float32)).astype(jnp.bfloat16)
    assert out3.dtype == jnp.bfloat16
    assert jnp.allclose(
        out3.astype(jnp.float32), ref3.astype(jnp.float32), atol=3e-2, rtol=3e-2
    ), "bf16 mismatch"

    print("KERNEL_OK")
</pallas_src>

<mosaic_0001>
module attributes {stable_mosaic.version = 11 : i64} {
  func.func @_simam_kernel(%arg0: i32, %arg1: memref<8x256xf32, #tpu.memory_space<vmem>>, %arg2: memref<8x256xf32, #tpu.memory_space<vmem>>) attributes {dimension_semantics = [#tpu.dimension_semantics<parallel>], iteration_bounds = array<i64: 1>, scalar_prefetch = 0 : i64, scratch_operands = 0 : i64, tpu.core_type = #tpu.core_type<tc>, window_params = [{transform_indices = @transform_0, window_bounds = array<i64: 8, 256>}, {transform_indices = @transform_1, window_bounds = array<i64: 8, 256>}]} {
    %c0 = arith.constant 0 : index
    %c0_0 = arith.constant 0 : index
    %0 = vector.load %arg1[%c0, %c0_0] : memref<8x256xf32, #tpu.memory_space<vmem>>, vector<8x256xf32>
    %cst = arith.constant dense<0.000000e+00> : vector<8xf32>
    %1 = vector.multi_reduction <add>, %0, %cst [1] : vector<8x256xf32> to vector<8xf32>
    %2 = vector.shape_cast %1 : vector<8xf32> to vector<8x1xf32>
    %cst_1 = arith.constant 3.906250e-03 : f32
    %3 = vector.broadcast %cst_1 : f32 to vector<8x1xf32>
    %4 = arith.mulf %2, %3 : vector<8x1xf32>
    %5 = vector.broadcast %4 : vector<8x1xf32> to vector<8x256xf32>
    %6 = arith.subf %0, %5 : vector<8x256xf32>
    %7 = arith.mulf %6, %6 : vector<8x256xf32>
    %cst_2 = arith.constant dense<0.000000e+00> : vector<8xf32>
    %8 = vector.multi_reduction <add>, %7, %cst_2 [1] : vector<8x256xf32> to vector<8xf32>
    %9 = vector.shape_cast %8 : vector<8xf32> to vector<8x1xf32>
    %cst_3 = arith.constant 0.00392156886 : f32
    %10 = vector.broadcast %cst_3 : f32 to vector<8x1xf32>
    %11 = arith.mulf %9, %10 : vector<8x1xf32>
    %cst_4 = arith.constant 9.99999974E-5 : f32
    %12 = vector.broadcast %cst_4 : f32 to vector<8x1xf32>
    %13 = arith.addf %11, %12 : vector<8x1xf32>
    %cst_5 = arith.constant 4.000000e+00 : f32
    %14 = vector.broadcast %cst_5 : f32 to vector<8x1xf32>
    %15 = arith.mulf %14, %13 : vector<8x1xf32>
    %16 = tpu.reciprocal %15 : vector<8x1xf32> -> vector<8x1xf32>
    %17 = arith.mulf %6, %6 : vector<8x256xf32>
    %18 = vector.broadcast %16 : vector<8x1xf32> to vector<8x256xf32>
    %19 = arith.mulf %17, %18 : vector<8x256xf32>
    %cst_6 = arith.constant 5.000000e-01 : f32
    %20 = vector.broadcast %cst_6 : f32 to vector<8x256xf32>
    %21 = arith.addf %19, %20 : vector<8x256xf32>
    %22 = arith.negf %21 : vector<8x256xf32>
    %23 = math.exp %22 : vector<8x256xf32>
    %cst_7 = arith.constant 1.000000e+00 : f32
    %24 = vector.broadcast %cst_7 : f32 to vector<8x256xf32>
    %25 = arith.addf %24, %23 : vector<8x256xf32>
    %26 = arith.divf %24, %25 : vector<8x256xf32>
    %27 = arith.mulf %0, %26 : vector<8x256xf32>
    %c0_8 = arith.constant 0 : index
    %c0_9 = arith.constant 0 : index
    %28 = vector.load %arg2[%c0_8, %c0_9] : memref<8x256xf32, #tpu.memory_space<vmem>>, vector<8x256xf32>
    tpu.vector_store %arg2[%c0_8, %c0_9], %27 {strides = array<i32>} : memref<8x256xf32, #tpu.memory_space<vmem>>, vector<8x256xf32>,
    return
  }
  func.func @transform_0(%arg0: i32) -> (i32, i32) {
    %c0_i32 = arith.constant 0 : i32
    %c0_i32_0 = arith.constant 0 : i32
    return %arg0, %c0_i32 : i32, i32
  }
  func.func @transform_1(%arg0: i32) -> (i32, i32) {
    %c0_i32 = arith.constant 0 : i32
    %c0_i32_0 = arith.constant 0 : i32
    return %arg0, %c0_i32 : i32, i32
  }
}

</mosaic_0001>

<bundles_post_ra>
// kernel: tpu_custom_call.1
= control target key start
LH: loop header
LB: loop body
LE: loop exit
PB: predicated region body
PF: predicated region fallthrough
CT: control target
= control target key end

     0   :  { %6 = vsyncpa [#allocation3], 0  ;;  %s171_s0 = inlined_call_operand.hbm [shape: f32[8,256], index: 0, kind: input, shape index: {}]   ;;  %s172_s1 = inlined_call_operand.hbm [shape: f32[8,256], index: 1, kind: output, shape index: {}]  }
   0x1   :  { %7 = vsyncpa [#allocation4], 0  ;;  %s135_s6 = smov [#allocation2]   ;;  %s87_s10 = scalar_lea.hbm %s171_s0, 256 }
   0x2   :  { %s14_s7 = sshll.u32 %s135_s6, 4  ;;  %p88_p0 = scmp.ne.s32.totalorder %s171_s0, %s87_s10  ;;  %s15_s7 = int_to_ptr.vmem [resolvable:$true] %s14_s7 }
   0x3   :  { %p91_p1 = scmp.lt.u32.totalorder %s87_s10, %s171_s0 }
   0x5   :  { %p93_p2 = pnand %p91_p1, %p88_p0 }
   0x7   :  { %96 = shalt.err (!%p93_p2)
}
   0x8   :  { %s97_s15 = scalar_lea.vmem %s15_s7, 256  ;;  %p102_p4 = scmp.lt.s32.totalorder %s15_s7, %s15_s7 }
   0x9   :  { %p98_p3 = scmp.ne.s32.totalorder %s15_s7, %s97_s15  ;;  %p103_p5 = scmp.lt.s32.totalorder %s97_s15, %s97_s15 }
   0xb   :  { %p104_p6 = por %p103_p5, %p102_p4 }
   0xd   :  { %p105_p7 = pnand %p104_p6, %p98_p3 }
   0xf   :  { %108 = shalt.err (!%p105_p7)
}
  0x10   :  { %17 = dma.hbm_to_vmem [thread:$0]  %s171_s0, 256, %s15_s7, [#allocation3]  }
  0x11   :  { %131 = dma.done.wait [#allocation3], 256  }
  0x12   :  { %132 = vsyncadd [#allocation3], 4294967040  ;;  %v21_v0 = vld [vmem:[#allocation2] sm:$0xff]  ;;  %v22_v1 = vld [vmem:[#allocation2 + $0x8] sm:$0xff]  ;;  %s136_s0 = smov [#allocation5]  }
  0x13   :  { %v23_v2 = vadd.f32 %v22_v1, %v21_v0  ;;  %s64_s18 = sshll.u32 %s136_s0, 4  ;;  %s65_s18 = int_to_ptr.vmem [resolvable:$true] %s64_s18 }
  0x14   :  { %s109_s19 = scalar_lea.vmem %s65_s18, 256  ;;  %p114_p9 = scmp.lt.s32.totalorder %s65_s18, %s65_s18 }
  0x15   :  { %24 = vadd.xlane.f32.xlu0 %v23_v2  ;;  %p110_p8 = scmp.ne.s32.totalorder %s65_s18, %s109_s19  ;;  %p115_p10 = scmp.lt.s32.totalorder %s109_s19, %s109_s19 }
  0x17   :  { %p116_p11 = por %p115_p10, %p114_p9 }
  0x19   :  { %p117_p12 = pnand %p116_p11, %p110_p8 }
  0xa2   :  { %v25_v3 = vpop.xlane.xlu0 %24 }
  0xa3   :  { %v26_v4 = vmul.f32 0.00390625, %v25_v3 }
  0xa5   :  { %v27_v5 = vsub.f32 %v21_v0, %v26_v4  ;;  %v28_v6 = vsub.f32 %v22_v1, %v26_v4 }
  0xa7   :  { %v29_v7 = vmul.f32 %v27_v5, %v27_v5  ;;  %v30_v8 = vmul.f32 %v28_v6, %v28_v6 }
  0xa9   :  { %v31_v9 = vadd.f32 %v30_v8, %v29_v7 }
  0xab   :  { %32 = vadd.xlane.f32.xlu0 %v31_v9 }
 0x138   :  { %v33_v10 = vpop.xlane.xlu0 %32 }
 0x139   :  { %v34_v11 = vmul.f32 0.003921569, %v33_v10 }
 0x13b   :  { %v35_v12 = vadd.f32 0.0001, %v34_v11 }
 0x13d   :  { %v36_v13 = vmul.f32 4.0, %v35_v12 }
 0x13f   :  { %77 = vrcp.f32 %v36_v13 }
 0x149   :  { %v78_v14 = vpop.eup %77 }
 0x14a   :  { %v38_v15 = vmul.f32 %v78_v14, %v29_v7  ;;  %v39_v16 = vmul.f32 %v78_v14, %v30_v8 }
 0x14c   :  { %v40_v17 = vadd.f32 0.5, %v38_v15  ;;  %v41_v18 = vadd.f32 0.5, %v39_v16 }
 0x14e   :  { %v73_v19 = vmul.f32 -1.442695, %v40_v17  ;;  %v74_v20 = vmul.f32 -1.442695, %v41_v18 }
 0x150   :  { %79 = vpow2.f32 %v73_v19 }
 0x151   :  { %81 = vpow2.f32 %v74_v20 }
 0x15a   :  { %v80_v21 = vpop.eup %79 }
 0x15b   :  { %v82_v22 = vpop.eup %81  ;;  %v48_v23 = vadd.f32 1.0, %v80_v21 }
 0x15c   :  { %v49_v24 = vadd.f32 1.0, %v82_v22 }
 0x15d   :  { %83 = vrcp.f32 %v48_v23 }
 0x15e   :  { %85 = vrcp.f32 %v49_v24 }
 0x167   :  { %v84_v25 = vpop.eup %83 }
 0x168   :  { %v86_v26 = vpop.eup %85  ;;  %v54_v27 = vmul.f32 %v84_v25, %v21_v0 }
 0x169   :  { %v55_v28 = vmul.f32 %v86_v26, %v22_v1 }
 0x16a   :  { %56 = vst [vmem:[#allocation5] sm:$0xff] %v54_v27 }
 0x16b   :  { %57 = vst [vmem:[#allocation5 + $0x8] sm:$0xff] %v55_v28 }
 0x16c   :  { %120 = shalt.err (!%p117_p12)
}
 0x16d   :  { %s121_s22 = scalar_lea.hbm %s172_s1, 256 }
 0x16e   :  { %p122_p13 = scmp.ne.s32.totalorder %s172_s1, %s121_s22  ;;  %p125_p0 = scmp.lt.u32.totalorder %s121_s22, %s172_s1 }
 0x170   :  { %p127_p1 = pnand %p125_p0, %p122_p13 }
 0x172   :  { %130 = shalt.err (!%p127_p1)
}
 0x173   :  { %67 = dma.vmem_to_hbm [thread:$0]  %s65_s18, 256, %s172_s1, [#allocation4]  }
 0x174   :  { %133 = dma.done.wait [#allocation4], 256  }
 0x175   :  { %134 = vsyncadd [#allocation4], 4294967040 }
 0x176   :  { %71 = vsyncpa [#allocation3], 1 }
 0x177   :  { %72 = vsyncpa [#allocation4], 1 }

</bundles_post_ra>
